<compile_context>
chip_gen: v5e
topology: v5e:2x2
jax: 0.10.0
libtpu: 0.0.40
codegen_flags: <defaults>
</compile_context>

<pallas_src>
import functools

import jax
import jax.numpy as jnp
from jax import lax
from jax.experimental import pallas as pl
from jax.experimental.pallas import tpu as pltpu


_STAT_LANES = 128  # lane-replicated running-stat width (one vreg of lanes)


def _round_up(x, mult):
    return ((x + mult - 1) // mult) * mult


def _flash_attend_kernel(q_ref, k_ref, v_ref, o_ref,
                         q_scr, m_scr, l_scr, acc_scr,
                         *, scale, causal, n, m, m_pad, tq, tkv):
    # q_ref: (tq, d), k_ref/v_ref: (tkv, d), o_ref: (tq, d)  (leading (1,1)
    # batch/head dims squeezed away by pl.Squeezed()).
    qi = pl.program_id(2)
    ki = pl.program_id(3)
    nk = pl.num_programs(3)

    @pl.when(ki == 0)
    def _init():
        # Fold the softmax scale into the resident q tile once per q block
        # (instead of nk times); kept in q's native dtype for the MXU.
        q_scr[...] = (q_ref[...] * scale).astype(q_scr.dtype)
        m_scr[...] = jnp.full_like(m_scr, -jnp.inf)
        l_scr[...] = jnp.zeros_like(l_scr)
        acc_scr[...] = jnp.zeros_like(acc_scr)

    def _scores():
        # Contract last dims of q and k -> no explicit K transpose/relayout.
        return lax.dot_general(
            q_scr[...], k_ref[...], (((1,), (1,)), ((), ())),
            preferred_element_type=jnp.float32)              # (tq, tkv) f32

    def _update(s):
        m_prev = m_scr[...]                                  # (tq, 128)
        l_prev = l_scr[...]                                  # (tq, 128)
        m_cur = jnp.max(s, axis=-1, keepdims=True)           # (tq, 1)
        m_next = jnp.maximum(m_prev, m_cur)                  # (tq, 128)
        alpha = jnp.exp(m_prev - m_next)                     # (tq, 128)
        p = jnp.exp(s - m_next[:, :1])                       # (tq, tkv)
        l_scr[...] = alpha * l_prev + jnp.sum(p, axis=-1, keepdims=True)
        # Match reference semantics: probabilities cast to v.dtype before @ v.
        acc_scr[...] = acc_scr[...] * alpha[:, :1] + jnp.dot(
            p.astype(v_ref.dtype), v_ref[...],
            preferred_element_type=jnp.float32)
        m_scr[...] = m_next

    def _plain():
        _update(_scores())

    has_pad = (m_pad != m)

    def _masked():
        s = _scores()
        row_ids = qi * tq + lax.broadcasted_iota(jnp.int32, (tq, tkv), 0)
        col_ids = ki * tkv + lax.broadcasted_iota(jnp.int32, (tq, tkv), 1)
        if causal:
            # torch: triu(j - i + 1)  <=>  mask where col > row + (m - n).
            # -finfo.max (not -inf) so fully masked rows reproduce the
            # reference's uniform-softmax behavior when m < n.
            s = jnp.where(col_ids > row_ids + (m - n),
                          -jnp.finfo(jnp.float32).max, s)
        if has_pad:
            # Padded KV columns contribute exactly nothing.
            s = jnp.where(col_ids >= m, -jnp.inf, s)
        _update(s)

    # Apply per-element masks only on blocks that actually need them
    # (diagonal-straddling blocks / the last, padded KV block).  Interior
    # blocks take the mask-free path: no iota/compare/select VPU filler.
    mask_needed = None
    if causal:
        mask_needed = (ki * tkv + (tkv - 1)) > (qi * tq + (m - n))
    if has_pad:
        pad_blk = ki == nk - 1
        mask_needed = pad_blk if mask_needed is None else jnp.logical_or(
            mask_needed, pad_blk)

    if causal and m >= n:
        # KV blocks entirely above the causal diagonal: skip compute.  The
        # matching index_map clamp in attend() also elides their K/V DMAs,
        # so both FLOPs and HBM traffic drop ~2x for long causal sequences.
        # Block 0 is never skipped, so stats are always seeded first.
        computed = (ki * tkv) <= (qi * tq + (tq - 1) + (m - n))
    else:
        # m < n causal keeps the full loop so fully-masked rows reproduce the
        # reference's uniform-softmax behavior.
        computed = None

    if mask_needed is None and computed is None:
        _plain()
    elif mask_needed is None:
        pl.when(computed)(_plain)
    elif computed is None:
        pl.when(mask_needed)(_masked)
        pl.when(jnp.logical_not(mask_needed))(_plain)
    else:
        pl.when(jnp.logical_and(computed, mask_needed))(_masked)
        pl.when(jnp.logical_and(computed, jnp.logical_not(mask_needed)))(_plain)

    @pl.when(ki == nk - 1)
    def _finalize():
        # Exact division (once per q block, negligible cost).  The approximate
        # EUP reciprocal has ~0.4% relative error, visible for f32 outputs.
        l = l_scr[...][:, :1]
        o_ref[...] = (acc_scr[...] / l).astype(o_ref.dtype)


def attend(q, k, v, *, scale=None, causal=False, block_q=512, block_kv=512):
    """Pallas equivalent of Attend.forward.

    q: (b, h, n, d); k, v: (b, h, m, d).
    block_q/block_kv: 512 default (good for v5e/v6e/v7x at d<=128; the kernel
    is otherwise per-step-overhead / HBM bound).  VMEM stays well under the
    32 MiB scoped limit even on v7x.
    """
    b, h, n, d = q.shape
    kb, kh, m, kd = k.shape
    assert (kb, kd) == (b, d) and v.shape == k.shape
    # TODO(synk): grouped-query attention (kv_heads != heads) not handled.
    assert kh == h, "grouped-query (kv_heads != heads) not handled"

    if scale is None:
        scale = d ** -0.5

    tq = min(block_q, _round_up(n, 8))
    tkv = min(block_kv, _round_up(m, 8))
    n_pad = _round_up(n, tq)
    m_pad = _round_up(m, tkv)

    if n_pad != n:
        q = jnp.pad(q, ((0, 0), (0, 0), (0, n_pad - n), (0, 0)))
    if m_pad != m:
        pad = ((0, 0), (0, 0), (0, m_pad - m), (0, 0))
        k = jnp.pad(k, pad)
        v = jnp.pad(v, pad)

    grid = (b, h, n_pad // tq, m_pad // tkv)

    if causal and m >= n:
        # Clamp the kv block index for K/V: for blocks that the kernel skips
        # (fully above the diagonal) the index repeats, so the pipeline elides
        # the HBM->VMEM copy entirely.
        def kv_index_map(bi, hi, qi, ki):
            last_needed = (qi * tq + (tq - 1) + (m - n)) // tkv
            return (bi, hi, jnp.minimum(ki, last_needed), 0)
    else:
        def kv_index_map(bi, hi, qi, ki):
            return (bi, hi, ki, 0)

    kernel = functools.partial(
        _flash_attend_kernel,
        scale=scale, causal=causal, n=n, m=m, m_pad=m_pad, tq=tq, tkv=tkv)

    # TODO(synk): for small head_dim (<128 lanes) packing 2 heads per grid
    # step would give a lane-dense output slab and halve grid steps.
    out = pl.pallas_call(
        kernel,
        out_shape=jax.ShapeDtypeStruct((b, h, n_pad, d), q.dtype),
        grid_spec=pltpu.PrefetchScalarGridSpec(
            num_scalar_prefetch=0,
            grid=grid,
            in_specs=[
                pl.BlockSpec((pl.Squeezed(), pl.Squeezed(), tq, d),
                             lambda bi, hi, qi, ki: (bi, hi, qi, 0)),
                pl.BlockSpec((pl.Squeezed(), pl.Squeezed(), tkv, d),
                             kv_index_map),
                pl.BlockSpec((pl.Squeezed(), pl.Squeezed(), tkv, d),
                             kv_index_map),
            ],
            out_specs=pl.BlockSpec((pl.Squeezed(), pl.Squeezed(), tq, d),
                                   lambda bi, hi, qi, ki: (bi, hi, qi, 0)),
            scratch_shapes=[
                pltpu.VMEM((tq, d), q.dtype),                 # scaled q tile
                pltpu.VMEM((tq, _STAT_LANES), jnp.float32),   # running max
                pltpu.VMEM((tq, _STAT_LANES), jnp.float32),   # running sum
                pltpu.VMEM((tq, d), jnp.float32),             # output acc
            ],
        ),
        compiler_params=pltpu.CompilerParams(
            dimension_semantics=("parallel", "parallel", "parallel",
                                 "arbitrary"),
            vmem_limit_bytes=32 * 1024 * 1024,
        ),
    )(q, k, v)

    if n_pad != n:
        out = out[:, :, :n, :]
    return out


def attend_reference(q, k, v, *, scale=None, causal=False):
    """Pure-JAX reference mirroring the PyTorch forward exactly."""
    d = q.shape[-1]
    if scale is None:
        scale = d ** -0.5
    sim = jnp.einsum("bhid,bhjd->bhij", q, k) * scale
    if causal:
        i, j = sim.shape[-2:]
        row = jnp.arange(i)[:, None]
        col = jnp.arange(j)[None, :]
        mask = col > (row + (j - i))
        sim = jnp.where(mask, -jnp.finfo(sim.dtype).max, sim)
    attn = jax.nn.softmax(sim, axis=-1).astype(q.dtype)
    return jnp.einsum("bhij,bhjd->bhid", attn, v)


if __name__ == "__main__":
    key = jax.random.PRNGKey(0)
    ok = True

    # Small shapes consistent with the module's forward.
    kq, kk, kv = jax.random.split(key, 3)
    b, h, n, d = 2, 4, 8, 32
    q = jax.random.normal(kq, (b, h, n, d), dtype=jnp.float32)
    k = jax.random.normal(kk, (b, h, n, d), dtype=jnp.float32)
    v = jax.random.normal(kv, (b, h, n, d), dtype=jnp.float32)

    for causal in (False, True):
        out = jax.block_until_ready(attend(q, k, v, causal=causal))
        ref = attend_reference(q, k, v, causal=causal)
        if not jnp.allclose(out, ref, atol=2e-3, rtol=2e-3):
            ok = False
            print(f"mismatch small (causal={causal}): "
                  f"max abs err {jnp.max(jnp.abs(out - ref))}")

    # Secondary test exercising the tiled/padded path (multiple KV blocks,
    # causal block skipping + DMA eliding, q/kv padding masks).
    kq2, kk2, kv2 = jax.random.split(jax.random.PRNGKey(1), 3)
    b2, h2, n2, d2 = 1, 2, 320, 64
    q2 = jax.random.normal(kq2, (b2, h2, n2, d2), dtype=jnp.float32)
    k2 = jax.random.normal(kk2, (b2, h2, n2, d2), dtype=jnp.float32)
    v2 = jax.random.normal(kv2, (b2, h2, n2, d2), dtype=jnp.float32)

    for causal in (False, True):
        out = jax.block_until_ready(
            attend(q2, k2, v2, causal=causal, block_q=128, block_kv=128))
        ref = attend_reference(q2, k2, v2, causal=causal)
        if not jnp.allclose(out, ref, atol=2e-3, rtol=2e-3):
            ok = False
            print(f"mismatch tiled (causal={causal}): "
                  f"max abs err {jnp.max(jnp.abs(out - ref))}")

    if ok:
        print("KERNEL_OK")
</pallas_src>

<mosaic_0001>
module attributes {stable_mosaic.version = 11 : i64} {
  func.func @_flash_attend_kernel(%arg0: i32, %arg1: i32, %arg2: i32, %arg3: i32, %arg4: memref<1x1x8x32xf32, #tpu.memory_space<vmem>>, %arg5: memref<1x1x8x32xf32, #tpu.memory_space<vmem>>, %arg6: memref<1x1x8x32xf32, #tpu.memory_space<vmem>>, %arg7: memref<1x1x8x32xf32, #tpu.memory_space<vmem>>, %arg8: memref<8x32xf32, #tpu.memory_space<vmem>>, %arg9: memref<8x128xf32, #tpu.memory_space<vmem>>, %arg10: memref<8x128xf32, #tpu.memory_space<vmem>>, %arg11: memref<8x32xf32, #tpu.memory_space<vmem>>) attributes {dimension_semantics = [#tpu.dimension_semantics<parallel>, #tpu.dimension_semantics<parallel>, #tpu.dimension_semantics<parallel>, #tpu.dimension_semantics<arbitrary>], iteration_bounds = array<i64: 2, 4, 1, 1>, scalar_prefetch = 0 : i64, scratch_operands = 4 : i64, tpu.core_type = #tpu.core_type<tc>, window_params = [{transform_indices = @transform_0, window_bounds = array<i64: 1, 1, 8, 32>}, {transform_indices = @transform_1, window_bounds = array<i64: 1, 1, 8, 32>}, {transform_indices = @transform_2, window_bounds = array<i64: 1, 1, 8, 32>}, {transform_indices = @transform_3, window_bounds = array<i64: 1, 1, 8, 32>}]} {
    %c0_i32 = arith.constant 0 : i32
    %0 = arith.cmpi eq, %arg3, %c0_i32 : i32
    %1 = arith.extui %0 : i1 to i32
    %c0_i32_0 = arith.constant 0 : i32
    %2 = arith.cmpi ne, %1, %c0_i32_0 : i32
    scf.if %2 {
      %c0_27 = arith.constant 0 : index
      %c0_28 = arith.constant 0 : index
      %c0_29 = arith.constant 0 : index
      %c0_30 = arith.constant 0 : index
      %38 = vector.load %arg4[%c0_27, %c0_28, %c0_29, %c0_30] : memref<1x1x8x32xf32, #tpu.memory_space<vmem>>, vector<1x1x8x32xf32>
      %39 = vector.shape_cast %38 : vector<1x1x8x32xf32> to vector<8x32xf32>
      %cst_31 = arith.constant 0.176776692 : f32
      %40 = vector.broadcast %cst_31 : f32 to vector<8x32xf32>
      %41 = arith.mulf %39, %40 : vector<8x32xf32>
      %c0_32 = arith.constant 0 : index
      %c0_33 = arith.constant 0 : index
      %42 = vector.load %arg8[%c0_32, %c0_33] : memref<8x32xf32, #tpu.memory_space<vmem>>, vector<8x32xf32>
      tpu.vector_store %arg8[%c0_32, %c0_33], %41 {strides = array<i32>} : memref<8x32xf32, #tpu.memory_space<vmem>>, vector<8x32xf32>,
      %cst_34 = arith.constant 0xFF800000 : f32
      %43 = vector.broadcast %cst_34 : f32 to vector<8x128xf32>
      %c0_35 = arith.constant 0 : index
      %c0_36 = arith.constant 0 : index
      %44 = vector.load %arg9[%c0_35, %c0_36] : memref<8x128xf32, #tpu.memory_space<vmem>>, vector<8x128xf32>
      tpu.vector_store %arg9[%c0_35, %c0_36], %43 {strides = array<i32>} : memref<8x128xf32, #tpu.memory_space<vmem>>, vector<8x128xf32>,
      %cst_37 = arith.constant 0.000000e+00 : f32
      %45 = vector.broadcast %cst_37 : f32 to vector<8x128xf32>
      %c0_38 = arith.constant 0 : index
      %c0_39 = arith.constant 0 : index
      %46 = vector.load %arg10[%c0_38, %c0_39] : memref<8x128xf32, #tpu.memory_space<vmem>>, vector<8x128xf32>
      tpu.vector_store %arg10[%c0_38, %c0_39], %45 {strides = array<i32>} : memref<8x128xf32, #tpu.memory_space<vmem>>, vector<8x128xf32>,
      %cst_40 = arith.constant 0.000000e+00 : f32
      %47 = vector.broadcast %cst_40 : f32 to vector<8x32xf32>
      %c0_41 = arith.constant 0 : index
      %c0_42 = arith.constant 0 : index
      %48 = vector.load %arg11[%c0_41, %c0_42] : memref<8x32xf32, #tpu.memory_space<vmem>>, vector<8x32xf32>
      tpu.vector_store %arg11[%c0_41, %c0_42], %47 {strides = array<i32>} : memref<8x32xf32, #tpu.memory_space<vmem>>, vector<8x32xf32>,
    } else {
    }
    %c0 = arith.constant 0 : index
    %c0_1 = arith.constant 0 : index
    %3 = vector.load %arg8[%c0, %c0_1] : memref<8x32xf32, #tpu.memory_space<vmem>>, vector<8x32xf32>
    %c0_2 = arith.constant 0 : index
    %c0_3 = arith.constant 0 : index
    %c0_4 = arith.constant 0 : index
    %c0_5 = arith.constant 0 : index
    %4 = vector.load %arg5[%c0_2, %c0_3, %c0_4, %c0_5] : memref<1x1x8x32xf32, #tpu.memory_space<vmem>>, vector<1x1x8x32xf32>
    %5 = vector.shape_cast %4 : vector<1x1x8x32xf32> to vector<8x32xf32>
    %cst = arith.constant dense<0.000000e+00> : vector<8x8xf32>
    %6 = tpu.matmul %3, %5, %cst {dimension_numbers = #tpu.dot_dimension_numbers<[1], [1], [0], [0], [0, 0, 1, 0], [], []>} : vector<8x32xf32>, vector<8x32xf32>, vector<8x8xf32> -> vector<8x8xf32>
    %c0_6 = arith.constant 0 : index
    %c0_7 = arith.constant 0 : index
    %7 = vector.load %arg9[%c0_6, %c0_7] : memref<8x128xf32, #tpu.memory_space<vmem>>, vector<8x128xf32>
    %c0_8 = arith.constant 0 : index
    %c0_9 = arith.constant 0 : index
    %8 = vector.load %arg10[%c0_8, %c0_9] : memref<8x128xf32, #tpu.memory_space<vmem>>, vector<8x128xf32>
    %cst_10 = arith.constant dense<0xFF800000> : vector<8xf32>
    %9 = vector.multi_reduction <maximumf>, %6, %cst_10 [1] : vector<8x8xf32> to vector<8xf32>
    %10 = vector.shape_cast %9 : vector<8xf32> to vector<8x1xf32>
    %11 = vector.broadcast %10 : vector<8x1xf32> to vector<8x128xf32>
    %12 = arith.maximumf %7, %11 : vector<8x128xf32>
    %13 = arith.subf %7, %12 : vector<8x128xf32>
    %14 = math.exp %13 : vector<8x128xf32>
    %15 = vector.extract_strided_slice %12 {offsets = [0, 0], sizes = [8, 1], strides = [1, 1]} : vector<8x128xf32> to vector<8x1xf32>
    %16 = vector.broadcast %15 : vector<8x1xf32> to vector<8x8xf32>
    %17 = arith.subf %6, %16 : vector<8x8xf32>
    %18 = math.exp %17 : vector<8x8xf32>
    %19 = arith.mulf %14, %8 : vector<8x128xf32>
    %cst_11 = arith.constant dense<0.000000e+00> : vector<8xf32>
    %20 = vector.multi_reduction <add>, %18, %cst_11 [1] : vector<8x8xf32> to vector<8xf32>
    %21 = vector.shape_cast %20 : vector<8xf32> to vector<8x1xf32>
    %22 = vector.broadcast %21 : vector<8x1xf32> to vector<8x128xf32>
    %23 = arith.addf %19, %22 : vector<8x128xf32>
    %c0_12 = arith.constant 0 : index
    %c0_13 = arith.constant 0 : index
    %24 = vector.load %arg10[%c0_12, %c0_13] : memref<8x128xf32, #tpu.memory_space<vmem>>, vector<8x128xf32>
    tpu.vector_store %arg10[%c0_12, %c0_13], %23 {strides = array<i32>} : memref<8x128xf32, #tpu.memory_space<vmem>>, vector<8x128xf32>,
    %c0_14 = arith.constant 0 : index
    %c0_15 = arith.constant 0 : index
    %25 = vector.load %arg11[%c0_14, %c0_15] : memref<8x32xf32, #tpu.memory_space<vmem>>, vector<8x32xf32>
    %26 = vector.extract_strided_slice %14 {offsets = [0, 0], sizes = [8, 1], strides = [1, 1]} : vector<8x128xf32> to vector<8x1xf32>
    %27 = vector.broadcast %26 : vector<8x1xf32> to vector<8x32xf32>
    %28 = arith.mulf %25, %27 : vector<8x32xf32>
    %c0_16 = arith.constant 0 : index
    %c0_17 = arith.constant 0 : index
    %c0_18 = arith.constant 0 : index
    %c0_19 = arith.constant 0 : index
    %29 = vector.load %arg6[%c0_16, %c0_17, %c0_18, %c0_19] : memref<1x1x8x32xf32, #tpu.memory_space<vmem>>, vector<1x1x8x32xf32>
    %30 = vector.shape_cast %29 : vector<1x1x8x32xf32> to vector<8x32xf32>
    %cst_20 = arith.constant dense<0.000000e+00> : vector<8x32xf32>
    %31 = tpu.matmul %18, %30, %cst_20 {dimension_numbers = #tpu.dot_dimension_numbers<[1], [0], [0], [1], [0, 0, 1, 1], [], []>} : vector<8x8xf32>, vector<8x32xf32>, vector<8x32xf32> -> vector<8x32xf32>
    %32 = arith.addf %28, %31 : vector<8x32xf32>
    %c0_21 = arith.constant 0 : index
    %c0_22 = arith.constant 0 : index
    %33 = vector.load %arg11[%c0_21, %c0_22] : memref<8x32xf32, #tpu.memory_space<vmem>>, vector<8x32xf32>
    tpu.vector_store %arg11[%c0_21, %c0_22], %32 {strides = array<i32>} : memref<8x32xf32, #tpu.memory_space<vmem>>, vector<8x32xf32>,
    %c0_23 = arith.constant 0 : index
    %c0_24 = arith.constant 0 : index
    %34 = vector.load %arg9[%c0_23, %c0_24] : memref<8x128xf32, #tpu.memory_space<vmem>>, vector<8x128xf32>
    tpu.vector_store %arg9[%c0_23, %c0_24], %12 {strides = array<i32>} : memref<8x128xf32, #tpu.memory_space<vmem>>, vector<8x128xf32>,
    %c0_i32_25 = arith.constant 0 : i32
    %35 = arith.cmpi eq, %arg3, %c0_i32_25 : i32
    %36 = arith.extui %35 : i1 to i32
    %c0_i32_26 = arith.constant 0 : i32
    %37 = arith.cmpi ne, %36, %c0_i32_26 : i32
    scf.if %37 {
      %c0_27 = arith.constant 0 : index
      %c0_28 = arith.constant 0 : index
      %38 = vector.load %arg10[%c0_27, %c0_28] : memref<8x128xf32, #tpu.memory_space<vmem>>, vector<8x128xf32>
      %39 = vector.extract_strided_slice %38 {offsets = [0, 0], sizes = [8, 1], strides = [1, 1]} : vector<8x128xf32> to vector<8x1xf32>
      %c0_29 = arith.constant 0 : index
      %c0_30 = arith.constant 0 : index
      %40 = vector.load %arg11[%c0_29, %c0_30] : memref<8x32xf32, #tpu.memory_space<vmem>>, vector<8x32xf32>
      %41 = vector.broadcast %39 : vector<8x1xf32> to vector<8x32xf32>
      %42 = arith.divf %40, %41 : vector<8x32xf32>
      %c0_31 = arith.constant 0 : index
      %c0_32 = arith.constant 0 : index
      %c0_33 = arith.constant 0 : index
      %c0_34 = arith.constant 0 : index
      %43 = vector.load %arg7[%c0_31, %c0_32, %c0_33, %c0_34] : memref<1x1x8x32xf32, #tpu.memory_space<vmem>>, vector<1x1x8x32xf32>
      %44 = vector.shape_cast %43 : vector<1x1x8x32xf32> to vector<8x32xf32>
      %45 = vector.shape_cast %42 : vector<8x32xf32> to vector<1x1x8x32xf32>
      tpu.vector_store %arg7[%c0_31, %c0_32, %c0_33, %c0_34], %45 {strides = array<i32>} : memref<1x1x8x32xf32, #tpu.memory_space<vmem>>, vector<1x1x8x32xf32>,
    } else {
    }
    return
  }
  func.func @transform_0(%arg0: i32, %arg1: i32, %arg2: i32, %arg3: i32) -> (i32, i32, i32, i32) {
    %c0_i32 = arith.constant 0 : i32
    %c0_i32_0 = arith.constant 0 : i32
    return %arg0, %arg1, %arg2, %c0_i32 : i32, i32, i32, i32
  }
  func.func @transform_1(%arg0: i32, %arg1: i32, %arg2: i32, %arg3: i32) -> (i32, i32, i32, i32) {
    %c0_i32 = arith.constant 0 : i32
    %c0_i32_0 = arith.constant 0 : i32
    return %arg0, %arg1, %arg3, %c0_i32 : i32, i32, i32, i32
  }
  func.func @transform_2(%arg0: i32, %arg1: i32, %arg2: i32, %arg3: i32) -> (i32, i32, i32, i32) {
    %c0_i32 = arith.constant 0 : i32
    %c0_i32_0 = arith.constant 0 : i32
    return %arg0, %arg1, %arg3, %c0_i32 : i32, i32, i32, i32
  }
  func.func @transform_3(%arg0: i32, %arg1: i32, %arg2: i32, %arg3: i32) -> (i32, i32, i32, i32) {
    %c0_i32 = arith.constant 0 : i32
    %c0_i32_0 = arith.constant 0 : i32
    return %arg0, %arg1, %arg2, %c0_i32 : i32, i32, i32, i32
  }
}

</mosaic_0001>

<bundles_post_ra>
// kernel: tpu_custom_call.1
= control target key start
LH: loop header
LB: loop body
LE: loop exit
PB: predicated region body
PF: predicated region fallthrough
CT: control target
= control target key end

     0   :  { %s1129_s0 = inlined_call_operand.hbm [shape: f32[2,4,8,32], index: 0, kind: input, shape index: {}]   ;;  %s1130_s1 = inlined_call_operand.hbm [shape: f32[2,4,8,32], index: 1, kind: input, shape index: {}]   ;;  %s1131_s2 = inlined_call_operand.hbm [shape: f32[2,4,8,32], index: 2, kind: input, shape index: {}]   ;;  %s1132_s3 = inlined_call_operand.hbm [shape: f32[2,4,8,32], index: 3, kind: output, shape index: {}]  }
   0x1   :  { %1138 = sst [smem:[#allocation22_spill]] %s1130_s1 }
   0x2   :  { %8 = vsyncpa [#allocation7], 0 }
   0x3   :  { %10 = vsyncpa [#allocation7 + $0x1], 0 }
   0x4   :  { %11 = vsyncpa [#allocation10], 0 }
   0x5   :  { %13 = vsyncpa [#allocation10 + $0x1], 0 }
   0x6   :  { %14 = vsyncpa [#allocation8], 0 }
   0x7   :  { %16 = vsyncpa [#allocation8 + $0x1], 0  ;;  %s940_s12 = smov 0   ;;  %s942_s13 = smov 0  }
   0x8   :  { %s944_s14 = smov 0   ;;  %s946_s15 = smov 0  }
   0x9   :  { %s948_s16 = smov 0   ;;  %s950_s17 = smov 0  }
   0xa   :  { %s952_s18 = smov 0   ;;  %s954_s19 = smov 0  }
   0xb LB: > { %1139 = sst [smem:[#allocation16_spill]] %s896_s14  ;;  %s981_s20 = sadd.s32 4294967295, %s916_s19   ;;  %s916_s19 = sphi %s954_s19, %s22_s19   ;;  %s912_s18 = sphi %s952_s18, %s1157_s18   ;;  %s908_s17 = sphi %s950_s17, %s1161_s17   ;;  %s904_s16 = sphi %s948_s16, %s1155_s16   ;;  %s900_s15 = sphi %s946_s15, %s1154_s15   ;;  %s896_s14 = sphi %s944_s14, %s1160_s14   ;;  %s892_s13 = sphi %s942_s13, %s1159_s13   ;;  %s888_s12 = sphi %s940_s12, %s1158_s12  }
   0xc   : > { %1140 = sst [smem:[#allocation17_spill]] %s908_s17  ;;  %s600_s21 = sadd.s32 4294967294, %s916_s19  }
   0xd   : > { %1141 = sst [smem:[#allocation18_spill]] %s912_s18  ;;  %s44_s22 = sadd.s32 1, %s908_s17 }
   0xe   : > { %s48_s23 = sadd.s32 1, %s912_s18  ;;  %p46_p0 = scmp.ge.s32.totalorder %s44_s22, 4 }
   0xf   : > { %s59_s24 = sadd.s32 1, %s896_s14  ;;  %p66_p1 = scmp.ne.s32.totalorder %s896_s14, %s892_s13 }
  0x10   : > { %p67_p2 = scmp.eq.s32.totalorder %s916_s19, 0  ;;  %s1163_s22 = smov (%p46_p0, %s44_s22), 0 }
  0x11   : > { %1142 = sst [smem:[#allocation19_spill]] %s1163_s22  ;;  %s1165_s23 = smov (!%p46_p0, %s48_s23), %s912_s18 }
  0x12   : > { %s53_s25 = ssub.s32 %s908_s17, %s1163_s22  ;;  %p995_p3 = por %p67_p2, %p66_p1 }
  0x13   : > { %p50_p4 = scmp.ge.s32.totalorder %s1165_s23, 2  ;;  %p72_p5 = scmp.ne.s32.totalorder %s892_s13, %s888_s12 }
  0x14   : > { %p73_p6 = scmp.eq.s32.totalorder %s981_s20, 0  ;;  %p160_p7 = scmp.eq.s32.totalorder %s981_s20, 7 }
  0x15   : > { %s1167_s23 = smov (%p50_p4, %s1165_s23), 0  ;;  %p166_p10 = scmp.eq.s32.totalorder %s600_s21, 7 }
  0x16   : > { %1144 = sst [smem:[#allocation20_spill]] %s1167_s23  ;;  %p1005_p8 = por %p73_p6, %p72_p5 }
  0x17   : > { %p1009_p9 = por %p160_p7, %p66_p1  ;;  %s52_s29 = ssub.s32 %s912_s18, %s1167_s23 }
  0x18   : > { %s54_s30 = sor.u32 %s53_s25, %s52_s29  ;;  %p1015_p12 = por %p166_p10, %p72_p5 }
  0x19   : > { %p57_p11 = scmp.eq.s32.totalorder %s54_s30, 0  ;;  %p647_p13 = scmp.lt.s32.totalorder %s916_s19, 8 }
  0x1a   : > { %s186_s5 = sand.u32 1, %s896_s14   ;;  %s604_s8 = sshll.u32 %s912_s18, 2 }
  0x1b   : > { %s1022_s6 = scalar_select %p57_p11, %s896_s14, %s59_s24  }
  0x1c   : > { %s603_s7 = sshll.u32 %s186_s5, 3  ;;  %s195_s9 = sadd.s32 %s908_s17, %s604_s8 }
  0x1d   : > { %1148 = sst [smem:[#allocation21_spill]] %s1022_s6  ;;  %p1028_p0 = pnand %p647_p13, %p995_p3 }
  0x1e   : > { %s605_s11 = sshll.u32 %s195_s9, 3  ;;  %s208_s21 = sand.u32 1, %s916_s19  }
  0x1f   : > { %s1150_s1 = sld [smem:[#allocation22_spill]]  ;;  %s212_s22 = scalar_lea.vmem [#allocation9], %s603_s7 }
  0x20   : > { %s223_s24 = sshll.u32 %s212_s22, 4  ;;  %s209_s18 = scalar_lea.sflag [#allocation10], %s208_s21  ;;  %s224_s24 = int_to_ptr.vmem [resolvable:$true] %s223_s24 }
  0x21   : > { %p612_p1 = scmp.ge.s32.totalorder %s916_s19, 1  ;;  %p250_p2 = scmp.lt.s32.totalorder %s916_s19, 9 }
  0x22   : > { %s197_s25 = scalar_lea.hbm %s1129_s0, %s605_s11  ;;  %s187_s22 = scalar_lea.sflag [#allocation7], %s186_s5 }
  0x23   : > { %p1040_p3 = pnand %p612_p1, %p250_p2  ;;  %s199_s29 = sshll.u32 %s197_s25, 4  ;;  %s200_s29 = int_to_ptr.hbm [resolvable:$true] %s199_s29 }
  0x24   : > { %s234_s6 = scalar_lea.vmem [#allocation11], %s603_s7  ;;  %s1057_s8 = sand.u32 (!%p1040_p3), 1, %s892_s13  }
  0x25   : > { %s219_s30 = scalar_lea.hbm %s1150_s1, %s605_s11  ;;  %s245_s14 = sshll.u32 %s234_s6, 4  ;;  %s246_s14 = int_to_ptr.vmem [resolvable:$true] %s245_s14 }
  0x26   : > { %s221_s23 = sshll.u32 %s219_s30, 4  ;;  %s190_s30 = scalar_lea.vmem [#allocation6], %s603_s7  ;;  %s222_s23 = int_to_ptr.hbm [resolvable:$true] %s221_s23 }
  0x27   : > { %639 = dma.hbm_to_vmem [thread:$0]  (!%p1028_p0), %s222_s23, 128, %s224_s24, %s209_s18  }
  0x28   : > { %s201_s1 = sshll.u32 %s190_s30, 4  ;;  %s241_s24 = scalar_lea.hbm %s1131_s2, %s605_s11  ;;  %s202_s1 = int_to_ptr.vmem [resolvable:$true] %s201_s1 }
  0x29   : > { %636 = dma.hbm_to_vmem [thread:$0]  (!%p1028_p0), %s200_s29, 128, %s202_s1, %s187_s22  }
  0x2a   : > { %s243_s17 = sshll.u32 %s241_s24, 4  ;;  %254 = sbr.rel (%p1040_p3) target bundleno = 687 (0x2af), region = 32  ;;  %s244_s17 = int_to_ptr.hbm [resolvable:$true] %s243_s17 }
  0x2b   : > { %642 = dma.hbm_to_vmem [thread:$0]  (!%p1028_p0), %s244_s17, 128, %s246_s14, %s209_s18  }
  0x2c   : > { %s1060_s1 = sshll.u32 (!%p1040_p3), %s1057_s8, 3  ;;  %s257_s5 = scalar_lea.sflag (!%p1040_p3), [#allocation7], %s1057_s8 }
  0x2d   : > { %s260_s11 = scalar_lea.vmem (!%p1040_p3), [#allocation6], %s1060_s1 }
  0x2f   : > { %875 = dma.done.wait (%p1005_p8), %s257_s5, 128  }
  0x30   : > { %877 = vsyncadd (%p1005_p8), %s257_s5, 4294967168  ;;  %s266_s14 = sand.u32 1, %s981_s20   ;;  %s270_s18 = scalar_lea.vmem [#allocation9], %s1060_s1 }
  0x31   : > { %s267_s17 = scalar_lea.sflag [#allocation10], %s266_s14 }
  0x32   : > { %879 = dma.done.wait (%p1005_p8), %s267_s17, 256  }
  0x33   : > { %881 = vsyncadd (%p1005_p8), %s267_s17, 4294967040  ;;  %vm320_vm0 = vcmask 261120   ;;  %v918_v0 = vmov 0.0   ;;  %v318_v1 = vld [vmem:[%s260_s11] sm:$0xff]  ;;  %v326_v2 = vld [vmem:[%s270_s18] sm:$0xff]  ;;  %v919_v5 = vmov 0  }
  0x34   : > { %324 = vst.msk [vmem:[#allocation5] sm:$0xff] %vm320_vm0, %v918_v0  ;;  %v319_v3 = vmul.f32 0.17677669, %v318_v1  ;;  %617 = vmatpush.xpose.msk.msra.mxu0 %vm320_vm0, %v326_v2  ;;  %715 = vset.pattern.permute.xlu0 %v919_v5  ;;  %vm356_vm1 = vcmask 64512   ;;  %s280_s20 = scalar_lea.vmem [#allocation11], %s1060_s1  ;;  %s621_s27 = sshll.u32 %s904_s16, 2 }
  0x35   : > { %717 = vset.pattern.permute.xlu2 %v919_v5  ;;  %716 = vset.pattern.permute.xlu1 %v919_v5  ;;  %v385_v12 = vld [vmem:[%s280_s20] sm:$0xff]  ;;  %s450_s6 = sadd.s32 %s900_s15, %s621_s27  ;;  %s313_s25 = scalar_lea.vmem [#allocation12], %s1060_s1 }
  0x36   : > { %321 = vst.msk [vmem:[#allocation2] sm:$0xff] %vm320_vm0, %v319_v3  ;;  %404 = vmatpush.msra.mxu1 %v385_v12  ;;  %s622_s7 = sshll.u32 %s450_s6, 3  ;;  %s454_s15 = sshll.u32 %s313_s25, 4  ;;  %s455_s15 = int_to_ptr.vmem [resolvable:$true] %s454_s15 }
  0x37   : > { %s452_s9 = scalar_lea.hbm %s1132_s3, %s622_s7  ;;  %s439_s29 = scalar_lea.sflag [#allocation8], %s1057_s8 }
  0x38   : > { %s456_s16 = sshll.u32 %s452_s9, 4  ;;  %s834_s24 = scalar_lea.hbm %s1132_s3, 64  ;;  %s457_s16 = int_to_ptr.hbm [resolvable:$true] %s456_s16 }
  0x39   : > { %s828_s30 = sshra.s32 %s457_s16, 4  ;;  %s829_s30 = int_to_ptr.hbm [resolvable:$true] %s828_s30 }
  0x3a   : > { %s830_s22 = scalar_lea.hbm %s829_s30, 8  ;;  %p835_p7 = scmp.lt.s32.totalorder %s829_s30, %s1132_s3 }
  0x3b   : > { %v378_v21 = vld [vmem:[#allocation5] sm:$0xff]  ;;  %p831_p4 = scmp.ne.s32.totalorder %s829_s30, %s830_s22  ;;  %p836_p8 = scmp.lt.s32.totalorder %s834_s24, %s830_s22 }
  0x3d   : > { %v325_v4 = vld [vmem:[#allocation2] sm:$0xff]  ;;  %p832_p5 = pnand %p831_p4, %p1009_p9  ;;  %p837_p10 = por %p836_p8, %p835_p7 }
  0x3e   : > { %618 = vmatmul.msk.f32.vlgmr.msra.gmra.mxu0 %vm320_vm0, %v325_v4 }
  0x3f   : > { %p833_p6 = pneg %p832_p5 }
  0x41   : > { %p838_p11 = pnand %p837_p10, %p833_p6 }
  0xbb   : > { %v351_v6 = vpop.f32.mrf.mxu0 }
  0xbc   : > { %v357_v7 = vsel %vm356_vm1, %v351_v6, -inf }
  0xbd   : > { %358 = vmax.xlane.f32.xlu0 %v357_v7 }
 0x130   : > { %v359_v8 = vpop.xlane.xlu0 %358 }
 0x131   : > { %v361_v9 = vsub.f32 -inf, %v359_v8  ;;  %366 = vperm.xlu0 %715, %v359_v8  }
 0x133   : > { %v362_v10 = vmul.f32 1.442695, %v361_v9 }
 0x135   : > { %718 = vpow2.f32 %v362_v10 }
 0x13b   : > { %v719_v11 = vpop.eup %718 }
 0x13c   : > { %381 = vperm.xlu2 %717, %v719_v11   ;;  %v372_v18 = vmul.f32 0.0, %v719_v11 }
 0x196   : > { %v382_v22 = vpop.permute.xlu2 %381 }
 0x197   : > { %v384_v23 = vmul.f32 %v382_v22, %v378_v21 }
 0x1a3   : > { %v367_v13 = vpop.permute.xlu0 %366 }
 0x1a4   : > { %v369_v14 = vsub.f32 %v351_v6, %v367_v13 }
 0x1a6   : > { %v370_v15 = vmul.f32 1.442695, %v369_v14 }
 0x1a8   : > { %720 = vpow2.f32 %v370_v15 }
 0x1ae   : > { %v721_v16 = vpop.eup %720 }
 0x1af   : > { %619 = vmatmul.msk.f32.vlgmr.msra.gmra.mxu1 %vm356_vm1, %v721_v16  ;;  %v373_v17 = vsel %vm356_vm1, %v721_v16, 0.0 }
 0x1b0   : > { %374 = vadd.xlane.f32.xlu1 %v373_v17 }
 0x223   : > { %v375_v19 = vpop.xlane.xlu1 %374 }
 0x224   : > { %v376_v20 = vadd.f32 %v375_v19, %v372_v18 }
 0x226   : > { %419 = vperm.xlu1 %716, %v376_v20  }
 0x22c   : > { %v406_v24 = vpop.f32.mrf.mxu1 }
 0x22d   : > { %v409_v25 = vadd.f32 %v406_v24, %v384_v23 }
 0x22f   : > { %410 = vst.msk [vmem:[#allocation5] sm:$0xff] %vm320_vm0, %v409_v25 }
 0x236   : > { %v416_v36 = vld [vmem:[#allocation5] sm:$0xff] }
 0x298   : > { %v420_v26 = vpop.permute.xlu1 %419 }
 0x299   : > { %722 = vrcp.f32 %v420_v26  ;;  %v433_v30 = vand.u32 2147483648, %v420_v26  ;;  %v431_v32 = vand.u32 2147483647, %v420_v26  ;;  %vm427_vm3 = vweird.f32 %v420_v26 }
 0x29b   : > { %v434_v34 = vor.u32 1.1754944e-38, %v433_v30  ;;  %vm432_vm5 = vcmp.eq.f32.partialorder %v431_v32, 8.507059e+37 }
 0x29f   : > { %v723_v27 = vpop.eup %722 }
 0x2a0   : > { %v423_v28 = vmul.f32 %v723_v27, %v420_v26  ;;  %vm428_vm2 = vweird.f32 %v723_v27 }
 0x2a1   : > { %vm429_vm4 = vmor %vm427_vm3, %vm428_vm2 }
 0x2a2   : > { %v424_v29 = vsub.f32 1.0, %v423_v28 }
 0x2a4   : > { %v425_v31 = vmul.f32 %v723_v27, %v424_v29 }
 0x2a6   : > { %v426_v33 = vadd.f32 %v723_v27, %v425_v31 }
 0x2a8   : > { %v430_v35 = vsel %vm429_vm4, %v723_v27, %v426_v33 }
 0x2a9   : > { %v435_v37 = vsel %vm432_vm5, %v434_v34, %v430_v35 }
 0x2aa   : > { %v436_v38 = vmul.f32 %v435_v37, %v416_v36 }
 0x2ac   : > { %437 = vst.msk [vmem:[%s313_s25] sm:$0xff] %vm320_vm0, %v436_v38 }
 0x2ad   : > { %841 = shalt.err (!%p838_p11)
}
 0x2ae   : > { %631 = dma.vmem_to_hbm [thread:$0]  (%p1009_p9), %s455_s15, 128, %s457_s16, %s439_s29  }
 0x2af PF: > { %p648_p13 = scmp.ge.s32.totalorder %s916_s19, 2  ;;  %s468_s8 = sand.u32 1, %s888_s12  }
 0x2b0   : > { %s469_s11 = scalar_lea.sflag [#allocation8], %s468_s8 }
 0x2b1   : > { %p644_p0 = pnand %p648_p13, %p1015_p12 }
 0x2b3   : > { %p645_p1 = pneg %p644_p0 }
 0x2b5   : > { %883 = dma.done.wait (%p645_p1), %s469_s11, 128  }
 0x2b6   : > { %885 = vsyncadd (%p645_p1), %s469_s11, 4294967168  ;;  %s22_s19 = sadd.s32 1, %s916_s19   ;;  %s1152_s14 = sld [smem:[#allocation16_spill]] }
 0x2b7   : > { %p19_p2 = scmp.ge.s32.totalorder %s22_s19, 10   ;;  %s1153_s17 = sld [smem:[#allocation21_spill]] }
 0x2b8   : > { %s1154_s15 = sld [smem:[#allocation17_spill]]  ;;  %s1158_s12 = smov %s892_s13 }
 0x2b9   : > { %s1155_s16 = sld [smem:[#allocation18_spill]] }
 0x2ba   : > { %s1156_s28 = sld [smem:[#allocation19_spill]] }
 0x2bb   : > { %s1157_s18 = sld [smem:[#allocation20_spill]] }
 0x2bc   : > { %s1159_s13 = smov %s1152_s14  ;;  %21 = sbr.rel (!%p19_p2) target bundleno = 11 (0xb), region = 109 }
 0x2bd   : > { %s1160_s14 = smov %s1153_s17 }
 0x2c0   : > { %s1161_s17 = smov %s1156_s28 }
 0x2c1   :  { %475 = vsyncpa [#allocation7], 1 }
 0x2c2   :  { %477 = vsyncpa [#allocation7 + $0x1], 1 }
 0x2c3   :  { %478 = vsyncpa [#allocation10], 1 }
 0x2c4   :  { %480 = vsyncpa [#allocation10 + $0x1], 1 }
 0x2c5   :  { %481 = vsyncpa [#allocation8], 1 }
 0x2c6   :  { %483 = vsyncpa [#allocation8 + $0x1], 1 }

</bundles_post_ra>
